<compile_context>
chip_gen: v7x
topology: tpu7x:2x2x1
jax: 0.10.0
libtpu: 0.0.40
codegen_flags: <defaults>
</compile_context>

<pallas_src>
import functools

import jax
import jax.numpy as jnp
from jax.experimental import pallas as pl
from jax.experimental.pallas import tpu as pltpu


HIDDEN = 16  # fc1 output width, fixed by the module


def _round_up(x, m):
    return ((x + m - 1) // m) * m


def _choose_row_tile(n_rows, target=512):
    """Sublane-aligned row tile: big enough to amortize per-grid-step overhead,
    but keep >=2 grid steps (when rows allow) so v7x's 2 TensorCores both work."""
    if n_rows <= 8:
        return n_rows                       # single full-array block
    floor8 = (n_rows // 8) * 8              # largest multiple of 8 <= n_rows
    half8 = _round_up((n_rows + 1) // 2, 8)  # ~half the rows, 8-aligned
    return max(8, min(target, floor8, half8))


def _compute_q_kernel(z_ref, h_ref, w1z_ref, w1h_ref, w1id_ref, b1_ref,
                      w2_ref, b2_ref, q_ref, *, n_agents):
    """Fused fc1 (split into z/h/agent-id partial matmuls) -> ReLU -> fc2."""
    tm = h_ref.shape[0]                     # static row-tile size
    row0 = pl.program_id(0) * tm

    # One-hot agent id for this row tile, built in-registers (no HBM traffic).
    rows = jax.lax.broadcasted_iota(jnp.int32, (tm, n_agents), 0) + row0
    cols = jax.lax.broadcasted_iota(jnp.int32, (tm, n_agents), 1)
    agent_oh = (rows % n_agents == cols).astype(jnp.float32)

    # fc1: x @ W1 + b1  ==  z @ W1_z + h @ W1_h + onehot @ W1_id + b1
    h1 = (jnp.dot(z_ref[...], w1z_ref[...], preferred_element_type=jnp.float32)
          + jnp.dot(h_ref[...], w1h_ref[...], preferred_element_type=jnp.float32)
          + jnp.dot(agent_oh, w1id_ref[...], preferred_element_type=jnp.float32)
          + b1_ref[...])
    h1 = jnp.maximum(h1, 0.0)               # ReLU (f32 on the VPU)

    # fc2 into the lane-dense (128-wide, zero-padded) output slab.
    q = jnp.dot(h1, w2_ref[...], preferred_element_type=jnp.float32) + b2_ref[...]
    q_ref[...] = q.astype(q_ref.dtype)


@functools.partial(jax.jit, static_argnames=("n_agents", "row_tile"))
def _compute_q_pallas(z_rep, h, w1z, w1h, w1id, b1, w2p, b2p, *,
                      n_agents, row_tile):
    n_rows, rnn_dim = h.shape
    z_dim = z_rep.shape[1]
    out_pad = w2p.shape[1]
    grid = (pl.cdiv(n_rows, row_tile),)

    kernel = functools.partial(_compute_q_kernel, n_agents=n_agents)

    q_p = pl.pallas_call(
        kernel,
        out_shape=jax.ShapeDtypeStruct((n_rows, out_pad), jnp.float32),
        grid=grid,
        in_specs=[
            pl.BlockSpec((row_tile, z_dim), lambda i: (i, 0)),       # z_rep
            pl.BlockSpec((row_tile, rnn_dim), lambda i: (i, 0)),     # h
            pl.BlockSpec((z_dim, HIDDEN), lambda i: (0, 0)),         # W1_z
            pl.BlockSpec((rnn_dim, HIDDEN), lambda i: (0, 0)),       # W1_h
            pl.BlockSpec((n_agents, HIDDEN), lambda i: (0, 0)),      # W1_id
            pl.BlockSpec((1, HIDDEN), lambda i: (0, 0)),             # b1
            pl.BlockSpec((HIDDEN, out_pad), lambda i: (0, 0)),       # W2 (padded)
            pl.BlockSpec((1, out_pad), lambda i: (0, 0)),            # b2 (padded)
        ],
        out_specs=pl.BlockSpec((row_tile, out_pad), lambda i: (i, 0)),
        compiler_params=pltpu.CompilerParams(
            dimension_semantics=("parallel",)),
    )(z_rep, h, w1z, w1h, w1id, b1, w2p, b2p)

    return q_p


class ComputeQPallas:
    """JAX/Pallas port of src/modules/agents/cromac_agent.py::Compute_Q."""

    def __init__(self, rnn_hidden_dim, z_dim, output_dim, n_agents, key,
                 row_tile_target=512):
        self.rnn_hidden_dim = rnn_hidden_dim
        self.z_dim = z_dim
        self.output_dim = output_dim
        self.n_agents = n_agents
        self.row_tile_target = row_tile_target

        in_dim = z_dim + rnn_hidden_dim + n_agents
        k1, k2, k3, k4 = jax.random.split(key, 4)

        # nn.Linear-style init U(-1/sqrt(fan_in), +), stored as (in, out) so
        # the kernel computes x @ W + b (== PyTorch x @ W.T + b).
        bound1 = 1.0 / jnp.sqrt(jnp.float32(in_dim))
        bound2 = 1.0 / jnp.sqrt(jnp.float32(HIDDEN))
        w1 = jax.random.uniform(k1, (in_dim, HIDDEN), jnp.float32,
                                -bound1, bound1)
        # split fc1 weight by input segment, matching concat order (z, h, id)
        self.w1z = w1[:z_dim]
        self.w1h = w1[z_dim:z_dim + rnn_hidden_dim]
        self.w1id = w1[z_dim + rnn_hidden_dim:]
        self.b1 = jax.random.uniform(k2, (1, HIDDEN), jnp.float32,
                                     -bound1, bound1)

        w2 = jax.random.uniform(k3, (HIDDEN, output_dim), jnp.float32,
                                -bound2, bound2)
        b2 = jax.random.uniform(k4, (1, output_dim), jnp.float32,
                                -bound2, bound2)
        # zero-pad fc2 weight/bias so the kernel's output slab is lane-dense
        out_pad = max(128, _round_up(output_dim, 128))
        self.out_pad = out_pad
        self.w2p = jnp.zeros((HIDDEN, out_pad), jnp.float32).at[:, :output_dim].set(w2)
        self.b2p = jnp.zeros((1, out_pad), jnp.float32).at[:, :output_dim].set(b2)

    def _replicate_z(self, z):
        """z -> (bs * n_agents, z_dim), matching the PyTorch branches."""
        bs = z.shape[0]
        if z.ndim == 2:
            return jnp.repeat(z, self.n_agents, axis=0)   # repeat_interleave
        return z.reshape(bs * self.n_agents, -1)

    def __call__(self, h, z):
        h = h.astype(jnp.float32)
        z_rep = self._replicate_z(z.astype(jnp.float32))
        n_rows = h.shape[0]
        row_tile = _choose_row_tile(n_rows, self.row_tile_target)
        q_p = _compute_q_pallas(z_rep, h, self.w1z, self.w1h, self.w1id,
                                self.b1, self.w2p, self.b2p,
                                n_agents=self.n_agents, row_tile=row_tile)
        return q_p[:, :self.output_dim]

    def reference(self, h, z):
        """Pure-JAX reference (explicit concat path) for correctness checks."""
        h = h.astype(jnp.float32)
        z_rep = self._replicate_z(z.astype(jnp.float32))
        bs_agents = h.shape[0]
        agent_id = jnp.broadcast_to(
            jnp.eye(self.n_agents, dtype=jnp.float32)[None],
            (bs_agents // self.n_agents, self.n_agents, self.n_agents),
        ).reshape(bs_agents, self.n_agents)
        x = jnp.concatenate([z_rep, h, agent_id], axis=1)
        w1 = jnp.concatenate([self.w1z, self.w1h, self.w1id], axis=0)
        h1 = jnp.maximum(x @ w1 + self.b1, 0.0)
        w2 = self.w2p[:, :self.output_dim]
        b2 = self.b2p[:, :self.output_dim]
        return h1 @ w2 + b2


if __name__ == "__main__":
    # Small shapes consistent with the module
    rnn_hidden_dim = 32
    z_dim = 8
    output_dim = 6
    n_agents = 4
    bs = 2

    key = jax.random.PRNGKey(0)
    k_params, k_h, k_z2, k_z3 = jax.random.split(key, 4)

    model = ComputeQPallas(rnn_hidden_dim, z_dim, output_dim, n_agents, k_params)

    h = jax.random.normal(k_h, (bs * n_agents, rnn_hidden_dim), jnp.float32)
    z2 = jax.random.normal(k_z2, (bs, z_dim), jnp.float32)            # 2-D z path
    z3 = jax.random.normal(k_z3, (bs, n_agents, z_dim), jnp.float32)  # 3-D z path

    q2 = jax.block_until_ready(model(h, z2))
    q3 = jax.block_until_ready(model(h, z3))

    # Sanity check against pure-JAX reference
    ref2 = model.reference(h, z2)
    ref3 = model.reference(h, z3)
    assert q2.shape == (bs * n_agents, output_dim)
    assert q3.shape == (bs * n_agents, output_dim)
    assert jnp.allclose(q2, ref2, atol=1e-5, rtol=1e-5)
    assert jnp.allclose(q3, ref3, atol=1e-5, rtol=1e-5)

    print("KERNEL_OK")
</pallas_src>

<mosaic_0001>
module attributes {stable_mosaic.version = 11 : i64} {
  func.func @_compute_q_kernel(%arg0: i32, %arg1: memref<8x8xf32, #tpu.memory_space<vmem>>, %arg2: memref<8x32xf32, #tpu.memory_space<vmem>>, %arg3: memref<8x16xf32, #tpu.memory_space<vmem>>, %arg4: memref<32x16xf32, #tpu.memory_space<vmem>>, %arg5: memref<4x16xf32, #tpu.memory_space<vmem>>, %arg6: memref<1x16xf32, #tpu.memory_space<vmem>>, %arg7: memref<16x128xf32, #tpu.memory_space<vmem>>, %arg8: memref<1x128xf32, #tpu.memory_space<vmem>>, %arg9: memref<8x128xf32, #tpu.memory_space<vmem>>) attributes {dimension_semantics = [#tpu.dimension_semantics<parallel>], iteration_bounds = array<i64: 1>, scalar_prefetch = 0 : i64, scratch_operands = 0 : i64, tpu.core_type = #tpu.core_type<tc>, window_params = [{transform_indices = @transform_0, window_bounds = array<i64: 8, 8>}, {transform_indices = @transform_1, window_bounds = array<i64: 8, 32>}, {pipeline_mode = #tpu.pipeline_mode<synchronous>, transform_indices = @transform_2, window_bounds = array<i64: 8, 16>}, {pipeline_mode = #tpu.pipeline_mode<synchronous>, transform_indices = @transform_3, window_bounds = array<i64: 32, 16>}, {pipeline_mode = #tpu.pipeline_mode<synchronous>, transform_indices = @transform_4, window_bounds = array<i64: 4, 16>}, {pipeline_mode = #tpu.pipeline_mode<synchronous>, transform_indices = @transform_5, window_bounds = array<i64: 1, 16>}, {pipeline_mode = #tpu.pipeline_mode<synchronous>, transform_indices = @transform_6, window_bounds = array<i64: 16, 128>}, {pipeline_mode = #tpu.pipeline_mode<synchronous>, transform_indices = @transform_7, window_bounds = array<i64: 1, 128>}, {transform_indices = @transform_8, window_bounds = array<i64: 8, 128>}]} {
    %c8_i32 = arith.constant 8 : i32
    %0 = arith.muli %arg0, %c8_i32 : i32
    %1 = tpu.iota {dimensions = array<i32: 0>} : vector<8x4xi32>
    %2 = vector.broadcast %0 : i32 to vector<8x4xi32>
    %3 = arith.addi %1, %2 : vector<8x4xi32>
    %4 = tpu.iota {dimensions = array<i32: 1>} : vector<8x4xi32>
    %c4_i32 = arith.constant 4 : i32
    %c0_i32 = arith.constant 0 : i32
    %5 = arith.cmpi eq, %c4_i32, %c0_i32 : i32
    %c1_i32 = arith.constant 1 : i32
    %6 = arith.select %5, %c1_i32, %c4_i32 : i32
    %7 = vector.broadcast %6 : i32 to vector<8x4xi32>
    %8 = arith.remsi %3, %7 : vector<8x4xi32>
    %c0_i32_0 = arith.constant 0 : i32
    %9 = vector.broadcast %c0_i32_0 : i32 to vector<8x4xi32>
    %10 = arith.cmpi ne, %8, %9 : vector<8x4xi32>
    %c0_i32_1 = arith.constant 0 : i32
    %11 = vector.broadcast %c0_i32_1 : i32 to vector<8x4xi32>
    %12 = arith.cmpi slt, %8, %11 : vector<8x4xi32>
    %c0_i32_2 = arith.constant 0 : i32
    %13 = arith.cmpi slt, %6, %c0_i32_2 : i32
    %14 = vector.broadcast %13 : i1 to vector<8x4xi1>
    %15 = vector.broadcast %14 : vector<8x4xi1> to vector<8x4xi1>
    %16 = arith.xori %12, %15 : vector<8x4xi1>
    %17 = arith.andi %16, %10 : vector<8x4xi1>
    %18 = vector.broadcast %6 : i32 to vector<8x4xi32>
    %19 = arith.addi %8, %18 : vector<8x4xi32>
    %20 = arith.select %17, %19, %8 : vector<8x4xi1>, vector<8x4xi32>
    %21 = arith.cmpi eq, %20, %4 : vector<8x4xi32>
    %22 = arith.extui %21 : vector<8x4xi1> to vector<8x4xi32>
    %23 = arith.sitofp %22 : vector<8x4xi32> to vector<8x4xf32>
    %c0 = arith.constant 0 : index
    %c0_3 = arith.constant 0 : index
    %24 = vector.load %arg1[%c0, %c0_3] : memref<8x8xf32, #tpu.memory_space<vmem>>, vector<8x8xf32>
    %c0_4 = arith.constant 0 : index
    %c0_5 = arith.constant 0 : index
    %25 = vector.load %arg3[%c0_4, %c0_5] : memref<8x16xf32, #tpu.memory_space<vmem>>, vector<8x16xf32>
    %cst = arith.constant dense<0.000000e+00> : vector<8x16xf32>
    %26 = tpu.matmul %24, %25, %cst {dimension_numbers = #tpu.dot_dimension_numbers<[1], [0], [0], [1], [0, 0, 1, 1], [], []>} : vector<8x8xf32>, vector<8x16xf32>, vector<8x16xf32> -> vector<8x16xf32>
    %c0_6 = arith.constant 0 : index
    %c0_7 = arith.constant 0 : index
    %27 = vector.load %arg2[%c0_6, %c0_7] : memref<8x32xf32, #tpu.memory_space<vmem>>, vector<8x32xf32>
    %c0_8 = arith.constant 0 : index
    %c0_9 = arith.constant 0 : index
    %28 = vector.load %arg4[%c0_8, %c0_9] : memref<32x16xf32, #tpu.memory_space<vmem>>, vector<32x16xf32>
    %cst_10 = arith.constant dense<0.000000e+00> : vector<8x16xf32>
    %29 = tpu.matmul %27, %28, %cst_10 {dimension_numbers = #tpu.dot_dimension_numbers<[1], [0], [0], [1], [0, 0, 1, 1], [], []>} : vector<8x32xf32>, vector<32x16xf32>, vector<8x16xf32> -> vector<8x16xf32>
    %30 = arith.addf %26, %29 : vector<8x16xf32>
    %c0_11 = arith.constant 0 : index
    %c0_12 = arith.constant 0 : index
    %31 = vector.load %arg5[%c0_11, %c0_12] : memref<4x16xf32, #tpu.memory_space<vmem>>, vector<4x16xf32>
    %cst_13 = arith.constant dense<0.000000e+00> : vector<8x16xf32>
    %32 = tpu.matmul %23, %31, %cst_13 {dimension_numbers = #tpu.dot_dimension_numbers<[1], [0], [0], [1], [0, 0, 1, 1], [], []>} : vector<8x4xf32>, vector<4x16xf32>, vector<8x16xf32> -> vector<8x16xf32>
    %33 = arith.addf %30, %32 : vector<8x16xf32>
    %c0_14 = arith.constant 0 : index
    %c0_15 = arith.constant 0 : index
    %34 = vector.load %arg6[%c0_14, %c0_15] : memref<1x16xf32, #tpu.memory_space<vmem>>, vector<1x16xf32>
    %35 = vector.broadcast %34 : vector<1x16xf32> to vector<8x16xf32>
    %36 = arith.addf %33, %35 : vector<8x16xf32>
    %cst_16 = arith.constant 0.000000e+00 : f32
    %37 = vector.broadcast %cst_16 : f32 to vector<8x16xf32>
    %38 = arith.maximumf %36, %37 : vector<8x16xf32>
    %c0_17 = arith.constant 0 : index
    %c0_18 = arith.constant 0 : index
    %39 = vector.load %arg7[%c0_17, %c0_18] : memref<16x128xf32, #tpu.memory_space<vmem>>, vector<16x128xf32>
    %cst_19 = arith.constant dense<0.000000e+00> : vector<8x128xf32>
    %40 = tpu.matmul %38, %39, %cst_19 {dimension_numbers = #tpu.dot_dimension_numbers<[1], [0], [0], [1], [0, 0, 1, 1], [], []>} : vector<8x16xf32>, vector<16x128xf32>, vector<8x128xf32> -> vector<8x128xf32>
    %c0_20 = arith.constant 0 : index
    %c0_21 = arith.constant 0 : index
    %41 = vector.load %arg8[%c0_20, %c0_21] : memref<1x128xf32, #tpu.memory_space<vmem>>, vector<1x128xf32>
    %42 = vector.broadcast %41 : vector<1x128xf32> to vector<8x128xf32>
    %43 = arith.addf %40, %42 : vector<8x128xf32>
    %c0_22 = arith.constant 0 : index
    %c0_23 = arith.constant 0 : index
    %44 = vector.load %arg9[%c0_22, %c0_23] : memref<8x128xf32, #tpu.memory_space<vmem>>, vector<8x128xf32>
    tpu.vector_store %arg9[%c0_22, %c0_23], %43 {strides = array<i32>} : memref<8x128xf32, #tpu.memory_space<vmem>>, vector<8x128xf32>,
    return
  }
  func.func @transform_0(%arg0: i32) -> (i32, i32) {
    %c0_i32 = arith.constant 0 : i32
    %c0_i32_0 = arith.constant 0 : i32
    return %arg0, %c0_i32 : i32, i32
  }
  func.func @transform_1(%arg0: i32) -> (i32, i32) {
    %c0_i32 = arith.constant 0 : i32
    %c0_i32_0 = arith.constant 0 : i32
    return %arg0, %c0_i32 : i32, i32
  }
  func.func @transform_2(%arg0: i32) -> (i32, i32) {
    %c0_i32 = arith.constant 0 : i32
    %c0_i32_0 = arith.constant 0 : i32
    %c0_i32_1 = arith.constant 0 : i32
    return %c0_i32, %c0_i32_0 : i32, i32
  }
  func.func @transform_3(%arg0: i32) -> (i32, i32) {
    %c0_i32 = arith.constant 0 : i32
    %c0_i32_0 = arith.constant 0 : i32
    %c0_i32_1 = arith.constant 0 : i32
    return %c0_i32, %c0_i32_0 : i32, i32
  }
  func.func @transform_4(%arg0: i32) -> (i32, i32) {
    %c0_i32 = arith.constant 0 : i32
    %c0_i32_0 = arith.constant 0 : i32
    %c0_i32_1 = arith.constant 0 : i32
    return %c0_i32, %c0_i32_0 : i32, i32
  }
  func.func @transform_5(%arg0: i32) -> (i32, i32) {
    %c0_i32 = arith.constant 0 : i32
    %c0_i32_0 = arith.constant 0 : i32
    %c0_i32_1 = arith.constant 0 : i32
    return %c0_i32, %c0_i32_0 : i32, i32
  }
  func.func @transform_6(%arg0: i32) -> (i32, i32) {
    %c0_i32 = arith.constant 0 : i32
    %c0_i32_0 = arith.constant 0 : i32
    %c0_i32_1 = arith.constant 0 : i32
    return %c0_i32, %c0_i32_0 : i32, i32
  }
  func.func @transform_7(%arg0: i32) -> (i32, i32) {
    %c0_i32 = arith.constant 0 : i32
    %c0_i32_0 = arith.constant 0 : i32
    %c0_i32_1 = arith.constant 0 : i32
    return %c0_i32, %c0_i32_0 : i32, i32
  }
  func.func @transform_8(%arg0: i32) -> (i32, i32) {
    %c0_i32 = arith.constant 0 : i32
    %c0_i32_0 = arith.constant 0 : i32
    return %arg0, %c0_i32 : i32, i32
  }
}

</mosaic_0001>

<bundles_post_ra>
// kernel: _compute_q_pallas.1
= control target key start
LH: loop header
LB: loop body
LE: loop exit
PB: predicated region body
PF: predicated region fallthrough
CT: control target
= control target key end

     0   :  { %v31_v3 = vlaneseq  ;;  %v479_v4 = vmov 0.0|0.0   ;;  %v480_v6 = vmov 0.0   ;;  %vm133_vm0 = vcmask 64512   ;;  %s580_s0 = inlined_call_operand.vmem [shape: f32[8,8], index: 0, kind: input, shape index: {}]   ;;  %s581_s1 = inlined_call_operand.vmem [shape: f32[8,32], index: 1, kind: input, shape index: {}]   ;;  %s582_s2 = inlined_call_operand.vmem [shape: f32[8,16], index: 2, kind: input, shape index: {}]   ;;  %s583_s3 = inlined_call_operand.vmem [shape: f32[32,16], index: 3, kind: input, shape index: {}]   ;;  %s584_s4 = inlined_call_operand.vmem [shape: f32[4,16], index: 4, kind: input, shape index: {}]   ;;  %s585_s5 = inlined_call_operand.vmem [shape: f32[1,16], index: 5, kind: input, shape index: {}]   ;;  %s586_s6 = inlined_call_operand.vmem [shape: f32[16,128], index: 6, kind: input, shape index: {}]   ;;  %s587_s7 = inlined_call_operand.vmem [shape: f32[1,128], index: 7, kind: input, shape index: {}]   ;;  %s588_s8 = inlined_call_operand.hbm [shape: f32[8,128], index: 8, kind: output, shape index: {}]  }
   0x1   :  { %v55_v0 = vld [vmem:[%s583_s3] sm:$0xff]  ;;  %v56_v1 = vld [vmem:[%s583_s3 + $0x8] sm:$0xff]  ;;  %442 = vmatprep.subr.bf16.mxu0 %v479_v4  ;;  %425 = vmatprep.subr.mxu1 %v480_v6  ;;  %v57_v7 = vld [vmem:[%s583_s3 + $0x10] sm:$0xff]  ;;  %vm481_vm1 = vmmov 0   ;;  %vm212_vm2 = vcmask 1043456  }
   0x2   :  { %v53_v2 = vld [vmem:[%s582_s2] sm:$0xff]  ;;  %v443_v5 = vpack.c.bf16 %v56_v1, %v55_v0  ;;  %v58_v8 = vld [vmem:[%s583_s3 + $0x18] sm:$0xff]  ;;  %427 = vmatprep.mubr.msk.f32.mxu1 %vm481_vm1, %v480_v6  ;;  %v32_v11 = vshrl.u32 %v31_v3, 7  ;;  %v36_v12 = vand.u32 127, %v31_v3 }
   0x3   :  { %v52_v9 = vld [vmem:[%s580_s0] sm:$0xff]  ;;  %426 = vmatpush3.msra.mxu1 %v53_v2  ;;  %v446_v13 = vpack.c.bf16 %v58_v8, %v57_v7 }
   0x4   :  { %v207_v10 = vld [vmem:[%s584_s4] sm:$0xf]  ;;  %444 = vmatpush3.bf16.msra.mxu0 %v443_v5  ;;  %428 = vmatmul.mubr.msk.f32.vlgmr.msra.gmra.mrb[0].mxu1 %vm133_vm0, %v52_v9 }
   0x5   :  { %13 = vsyncpa [#allocation3], 0  ;;  %445 = vmatprep.subr.bf16.mxu0 %v479_v4  ;;  %430 = vmatprep.subr.mxu1 %v480_v6  ;;  %v41_v14 = vand.u32 3, %v32_v11  ;;  %vm208_vm3 = vcmask 31744   ;;  %v54_v15 = vld [vmem:[%s581_s1] sm:$0xff]  ;;  %vm59_vm5 = vcmask 261120  }
   0x6   :  { %431 = vmatpush3.msk.msra.mxu1 %vm212_vm2, %v207_v10  ;;  %422 = vmatprep.mubr.msk.f32.mxu0 %vm481_vm1, %v480_v6  ;;  %v296_v17 = vld [vmem:[%s586_s6] sm:$0xff]  ;;  %v297_v18 = vld [vmem:[%s586_s6 + $0x8] sm:$0xff]  ;;  %vm305_vm6 = vcmask 130048   ;;  %s482_s23 = smov [#allocation2]  }
   0x7   :  { %432 = vmatprep.mubr.msk.f32.mxu1 %vm481_vm1, %v480_v6  ;;  %vm49_vm4 = vcmp.eq.s32.totalorder %v41_v14, %v36_v12  ;;  %448 = vmatprep.subr.bf16.mxu1 %v479_v4  ;;  %v449_v19 = vpack.c.bf16 %v297_v18, %v296_v17  ;;  %v399_v27 = vld [vmem:[%s585_s5] ss:$0 sm:$0xff]  ;;  %s386_s24 = sshll.u32 %s482_s23, 4  ;;  %s387_s24 = int_to_ptr.vmem [resolvable:$true] %s386_s24 }
   0x8   :  { %447 = vmatpush3.bf16.msra.mxu0 %v446_v13  ;;  %v394_v16 = vsel %vm49_vm4, 1.0, %v480_v6  ;;  %v400_v31 = vld [vmem:[%s587_s7] ss:$0 sm:$0xff]  ;;  %s455_s25 = scalar_lea.vmem %s387_s24, 128  ;;  %p460_p1 = scmp.lt.s32.totalorder %s387_s24, %s387_s24 }
   0x9   :  { %433 = vmatmul.mubr.msk.f32.vlgmr.msra.gmra.mrb[2].mxu1 %vm208_vm3, %v394_v16  ;;  %p456_p0 = scmp.ne.s32.totalorder %s387_s24, %s455_s25  ;;  %p461_p2 = scmp.lt.s32.totalorder %s455_s25, %s455_s25 }
   0xa   :  { %439 = vmatprep.mubr.msk.f32.mxu1 %vm481_vm1, %v480_v6  ;;  %450 = vmatpush3.bf16.msra.mxu1 %v449_v19 }
   0xb   :  { %423 = vmatmul.mubr.msk.f32.vlgmr.msra.gmra.mrb[0].mxu0 %vm59_vm5, %v54_v15  ;;  %p462_p3 = por %p461_p2, %p460_p1 }
   0xd   :  { %p463_p4 = pnand %p462_p3, %p456_p0 }
  0xd7   :  { %v203_v20 = vpop.f32.mrb[0].mxu1 }
  0xd8   :  { %v429_v21 = vpop.f32.mrb[1].mxu1 }
  0xdc   :  { %v282_v22 = vpop.f32.mrb[2].mxu1 }
  0xdd   :  { %v434_v23 = vpop.f32.mrb[3].mxu1 }
  0xde   :  { %v129_v24 = vpop.f32.mrb[0].mxu0 }
  0xdf   :  { %v204_v25 = vadd.f32 %v203_v20, %v129_v24  ;;  %v424_v26 = vpop.f32.mrb[1].mxu0 }
  0xe1   :  { %v286_v28 = vadd.f32 %v282_v22, %v204_v25 }
  0xe3   :  { %v294_v29 = vadd.f32 %v399_v27, %v286_v28 }
  0xe5   :  { %v295_v30 = vmax.f32 %v294_v29, 0.0 }
  0xe7   :  { %440 = vmatmul.mubr.msk.f32.vlgmr.msra.gmra.mrb[4].mxu1 %vm305_vm6, %v295_v30 }
 0x1ba   :  { %v375_v32 = vpop.f32.mrb[4].mxu1 }
 0x1bb   :  { %v376_v33 = vadd.f32 %v400_v31, %v375_v32  ;;  %v441_v34 = vpop.f32.mrb[5].mxu1 }
 0x1bd   :  { %379 = vst [vmem:[#allocation2] sm:$0xff] %v376_v33 }
 0x1be   :  { %466 = shalt.err (!%p463_p4)
}
 0x1bf   :  { %s467_s27 = scalar_lea.hbm %s588_s8, 128 }
 0x1c0   :  { %p468_p5 = scmp.ne.s32.totalorder %s588_s8, %s467_s27  ;;  %p471_p6 = scmp.lt.u32.totalorder %s467_s27, %s588_s8 }
 0x1c2   :  { %p473_p7 = pnand %p471_p6, %p468_p5 }
 0x1c4   :  { %476 = shalt.err (!%p473_p7)
}
 0x1c5   :  { %389 = dma.vmem_to_hbm [thread:$0]  %s387_s24, 128, %s588_s8, [#allocation3]  }
 0x1c6   :  { %477 = dma.done.wait [#allocation3], 128  }
 0x1c7   :  { %478 = vsyncadd [#allocation3], 4294967168 }
 0x1c8   :  { %393 = vsyncpa [#allocation3], 1 }

</bundles_post_ra>
